<compile_context>
chip_gen: v7x
topology: tpu7x:2x2x1
jax: 0.10.0
libtpu: 0.0.40
codegen_flags: <defaults>
</compile_context>

<pallas_src>
import functools

import jax
import jax.numpy as jnp
from jax.experimental import pallas as pl
from jax.experimental.pallas import tpu as pltpu


def _layernorm_kernel(x_ref, a_ref, b_ref, o_ref, *, eps: float, features: int):
    x = x_ref[...].astype(jnp.float32)                       # (tile_rows, F)
    mean = jnp.mean(x, axis=-1, keepdims=True)                # (tile_rows, 1)
    diff = x - mean
    # torch.std default: unbiased (divide by N-1)
    denom = max(features - 1, 1)
    var = jnp.sum(diff * diff, axis=-1, keepdims=True) / denom
    std = jnp.sqrt(var)
    # One reciprocal per row (EUP slot) instead of F divides per row (VPU).
    inv = pl.reciprocal(std + eps, approx=False)              # (tile_rows, 1)
    a = a_ref[...]                                            # (1, F) f32
    b = b_ref[...]                                            # (1, F) f32
    y = a * (diff * inv) + b
    o_ref[...] = y.astype(o_ref.dtype)


def _round_up(n: int, m: int) -> int:
    return ((n + m - 1) // m) * m


def layer_norm(x, a_2, b_2, eps: float = 1e-6, tile_rows: int = 256,
               vmem_budget_bytes: int = 32 * 1024 * 1024):
    """x: (..., features); a_2, b_2: (features,). Normalizes over last axis."""
    orig_shape = x.shape
    features = orig_shape[-1]
    rows = 1
    for d in orig_shape[:-1]:
        rows *= d
    x2d = x.reshape(rows, features)

    in_bytes = jnp.dtype(x.dtype).itemsize
    # Sublane packing: 8 rows/vreg for 4-byte, 16 for 2-byte, 32 for 1-byte.
    sublane_mult = max(8, 32 // max(in_bytes, 1))

    # Cap tile_rows by a VMEM budget: double-buffered in + out tiles plus
    # ~2 f32 intermediates per element (conservative).
    bytes_per_row = features * (2 * in_bytes + 2 * in_bytes + 2 * 4)
    budget_rows = max(sublane_mult, vmem_budget_bytes // max(bytes_per_row, 1))
    tr = min(tile_rows, budget_rows, _round_up(rows, sublane_mult))
    tr = max(sublane_mult, (tr // sublane_mult) * sublane_mult)

    grid = (pl.cdiv(rows, tr),)

    # Pre-cast gamma/beta to f32 once (avoids per-grid-step casts in-kernel).
    a2d = a_2.reshape(1, features).astype(jnp.float32)
    b2d = b_2.reshape(1, features).astype(jnp.float32)

    # Only raise the scoped-VMEM limit when the working set actually needs it
    # (keeps defaults untouched for small shapes; never exceeds 56 MiB so it
    # stays safe on v7x's 64 MiB physical VMEM).
    est_need = 2 * tr * bytes_per_row
    cp_kwargs = dict(dimension_semantics=("parallel",))
    if est_need > 14 * 1024 * 1024:
        cp_kwargs["vmem_limit_bytes"] = min(max(est_need, 32 * 1024 * 1024),
                                            56 * 1024 * 1024)

    kernel = functools.partial(_layernorm_kernel, eps=eps, features=features)

    out = pl.pallas_call(
        kernel,
        out_shape=jax.ShapeDtypeStruct((rows, features), x.dtype),
        grid_spec=pltpu.PrefetchScalarGridSpec(
            num_scalar_prefetch=0,
            grid=grid,
            in_specs=[
                pl.BlockSpec((tr, features), lambda i: (i, 0)),
                pl.BlockSpec((1, features), lambda i: (0, 0)),
                pl.BlockSpec((1, features), lambda i: (0, 0)),
            ],
            out_specs=pl.BlockSpec((tr, features), lambda i: (i, 0)),
        ),
        compiler_params=pltpu.CompilerParams(**cp_kwargs),
    )(x2d, a2d, b2d)

    return out.reshape(orig_shape)


def layer_norm_ref(x, a_2, b_2, eps: float = 1e-6):
    """Pure-JAX reference matching the PyTorch forward exactly."""
    x32 = x.astype(jnp.float32)
    mean = jnp.mean(x32, axis=-1, keepdims=True)
    std = jnp.std(x32, axis=-1, keepdims=True, ddof=1)
    return (a_2 * (x32 - mean) / (std + eps) + b_2).astype(x.dtype)


if __name__ == "__main__":
    key = jax.random.PRNGKey(0)
    batch, seq, features = 2, 8, 32
    # NOTE: for production workloads, `features` should be a multiple of 128
    # (lane-dense loads/stores); this small demo shape is intentionally tiny.

    x = jax.random.normal(key, (batch, seq, features), dtype=jnp.float32)

    # Deterministic parameter init: matches nn.Parameter(torch.ones/zeros(features))
    a_2 = jnp.ones((features,), dtype=jnp.float32)
    b_2 = jnp.zeros((features,), dtype=jnp.float32)

    out = layer_norm(x, a_2, b_2)
    out = jax.block_until_ready(out)

    ref = layer_norm_ref(x, a_2, b_2)
    assert out.shape == x.shape
    assert jnp.allclose(out, ref, atol=1e-5, rtol=1e-5), "mismatch vs reference"

    print("KERNEL_OK")
</pallas_src>

<mosaic_0001>
module attributes {stable_mosaic.version = 11 : i64} {
  func.func @_layernorm_kernel(%arg0: i32, %arg1: memref<16x32xf32, #tpu.memory_space<vmem>>, %arg2: memref<1x32xf32, #tpu.memory_space<vmem>>, %arg3: memref<1x32xf32, #tpu.memory_space<vmem>>, %arg4: memref<16x32xf32, #tpu.memory_space<vmem>>) attributes {dimension_semantics = [#tpu.dimension_semantics<parallel>], iteration_bounds = array<i64: 1>, scalar_prefetch = 0 : i64, scratch_operands = 0 : i64, tpu.core_type = #tpu.core_type<tc>, window_params = [{transform_indices = @transform_0, window_bounds = array<i64: 16, 32>}, {pipeline_mode = #tpu.pipeline_mode<synchronous>, transform_indices = @transform_1, window_bounds = array<i64: 1, 32>}, {pipeline_mode = #tpu.pipeline_mode<synchronous>, transform_indices = @transform_2, window_bounds = array<i64: 1, 32>}, {transform_indices = @transform_3, window_bounds = array<i64: 16, 32>}]} {
    %c0 = arith.constant 0 : index
    %c0_0 = arith.constant 0 : index
    %0 = vector.load %arg1[%c0, %c0_0] : memref<16x32xf32, #tpu.memory_space<vmem>>, vector<16x32xf32>
    %cst = arith.constant dense<0.000000e+00> : vector<16xf32>
    %1 = vector.multi_reduction <add>, %0, %cst [1] : vector<16x32xf32> to vector<16xf32>
    %2 = vector.shape_cast %1 : vector<16xf32> to vector<16x1xf32>
    %cst_1 = arith.constant 3.200000e+01 : f32
    %3 = vector.broadcast %cst_1 : f32 to vector<16x1xf32>
    %4 = arith.divf %2, %3 : vector<16x1xf32>
    %5 = vector.broadcast %4 : vector<16x1xf32> to vector<16x32xf32>
    %6 = arith.subf %0, %5 : vector<16x32xf32>
    %7 = arith.mulf %6, %6 : vector<16x32xf32>
    %cst_2 = arith.constant dense<0.000000e+00> : vector<16xf32>
    %8 = vector.multi_reduction <add>, %7, %cst_2 [1] : vector<16x32xf32> to vector<16xf32>
    %9 = vector.shape_cast %8 : vector<16xf32> to vector<16x1xf32>
    %cst_3 = arith.constant 3.100000e+01 : f32
    %10 = vector.broadcast %cst_3 : f32 to vector<16x1xf32>
    %11 = arith.divf %9, %10 : vector<16x1xf32>
    %12 = math.sqrt %11 : vector<16x1xf32>
    %cst_4 = arith.constant 9.99999997E-7 : f32
    %13 = vector.broadcast %cst_4 : f32 to vector<16x1xf32>
    %14 = arith.addf %12, %13 : vector<16x1xf32>
    %15 = tpu.reciprocal %14 : vector<16x1xf32> -> vector<16x1xf32>
    %c0_5 = arith.constant 0 : index
    %c0_6 = arith.constant 0 : index
    %16 = vector.load %arg2[%c0_5, %c0_6] : memref<1x32xf32, #tpu.memory_space<vmem>>, vector<1x32xf32>
    %c0_7 = arith.constant 0 : index
    %c0_8 = arith.constant 0 : index
    %17 = vector.load %arg3[%c0_7, %c0_8] : memref<1x32xf32, #tpu.memory_space<vmem>>, vector<1x32xf32>
    %18 = vector.broadcast %15 : vector<16x1xf32> to vector<16x32xf32>
    %19 = arith.mulf %6, %18 : vector<16x32xf32>
    %20 = vector.broadcast %16 : vector<1x32xf32> to vector<16x32xf32>
    %21 = arith.mulf %20, %19 : vector<16x32xf32>
    %22 = vector.broadcast %17 : vector<1x32xf32> to vector<16x32xf32>
    %23 = arith.addf %21, %22 : vector<16x32xf32>
    %c0_9 = arith.constant 0 : index
    %c0_10 = arith.constant 0 : index
    %24 = vector.load %arg4[%c0_9, %c0_10] : memref<16x32xf32, #tpu.memory_space<vmem>>, vector<16x32xf32>
    tpu.vector_store %arg4[%c0_9, %c0_10], %23 {strides = array<i32>} : memref<16x32xf32, #tpu.memory_space<vmem>>, vector<16x32xf32>,
    return
  }
  func.func @transform_0(%arg0: i32) -> (i32, i32) {
    %c0_i32 = arith.constant 0 : i32
    %c0_i32_0 = arith.constant 0 : i32
    return %arg0, %c0_i32 : i32, i32
  }
  func.func @transform_1(%arg0: i32) -> (i32, i32) {
    %c0_i32 = arith.constant 0 : i32
    %c0_i32_0 = arith.constant 0 : i32
    %c0_i32_1 = arith.constant 0 : i32
    return %c0_i32, %c0_i32_0 : i32, i32
  }
  func.func @transform_2(%arg0: i32) -> (i32, i32) {
    %c0_i32 = arith.constant 0 : i32
    %c0_i32_0 = arith.constant 0 : i32
    %c0_i32_1 = arith.constant 0 : i32
    return %c0_i32, %c0_i32_0 : i32, i32
  }
  func.func @transform_3(%arg0: i32) -> (i32, i32) {
    %c0_i32 = arith.constant 0 : i32
    %c0_i32_0 = arith.constant 0 : i32
    return %arg0, %c0_i32 : i32, i32
  }
}

</mosaic_0001>

<bundles_post_ra>
// kernel: tpu_custom_call.1
= control target key start
LH: loop header
LB: loop body
LE: loop exit
PB: predicated region body
PF: predicated region fallthrough
CT: control target
= control target key end

     0   :  { %8 = vsyncpa [#allocation3], 0  ;;  %s239_s0 = inlined_call_operand.hbm [shape: f32[16,32], index: 0, kind: input, shape index: {}]   ;;  %s240_s1 = inlined_call_operand.vmem [shape: f32[1,32], index: 1, kind: input, shape index: {}]   ;;  %s241_s2 = inlined_call_operand.vmem [shape: f32[1,32], index: 2, kind: input, shape index: {}]   ;;  %s242_s3 = inlined_call_operand.hbm [shape: f32[16,32], index: 3, kind: output, shape index: {}]  }
   0x1   :  { %9 = vsyncpa [#allocation4], 0  ;;  %s173_s12 = smov [#allocation2]   ;;  %s125_s16 = scalar_lea.hbm %s239_s0, 256 }
   0x2   :  { %s15_s13 = sshll.u32 %s173_s12, 4  ;;  %p126_p0 = scmp.ne.s32.totalorder %s239_s0, %s125_s16  ;;  %s16_s13 = int_to_ptr.vmem [resolvable:$true] %s15_s13 }
   0x3   :  { %p129_p1 = scmp.lt.u32.totalorder %s125_s16, %s239_s0 }
   0x5   :  { %p131_p2 = pnand %p129_p1, %p126_p0 }
   0x7   :  { %134 = shalt.err (!%p131_p2)
}
   0x8   :  { %s135_s21 = scalar_lea.vmem %s16_s13, 256  ;;  %p140_p4 = scmp.lt.s32.totalorder %s16_s13, %s16_s13 }
   0x9   :  { %p136_p3 = scmp.ne.s32.totalorder %s16_s13, %s135_s21  ;;  %p141_p5 = scmp.lt.s32.totalorder %s135_s21, %s135_s21 }
   0xb   :  { %p142_p6 = por %p141_p5, %p140_p4 }
   0xd   :  { %p143_p7 = pnand %p142_p6, %p136_p3 }
   0xf   :  { %146 = shalt.err (!%p143_p7)
}
  0x10   :  { %s174_s22 = smov 128   ;;  %s175_s23 = smov 8  }
  0x11   :  { %21 = dma.hbm_to_vmem [thread:$0]  %s239_s0, 256, %s16_s13, [#allocation3], %s174_s22, %s174_s22, %s175_s23  }
  0x12   :  { %169 = dma.done.wait [#allocation3], 256  }
  0x13   :  { %170 = vsyncadd [#allocation3], 4294967040  ;;  %vm31_vm0 = vcmask 261120   ;;  %v29_v0 = vld [vmem:[#allocation2] sm:$0xff]  ;;  %v30_v1 = vld [vmem:[#allocation2 + $0x8] sm:$0xff]  ;;  %s176_s29 = smov [#allocation5]  }
  0x14   :  { %v32_v2 = vsel %vm31_vm0, %v29_v0, 0.0  ;;  %v35_v3 = vsel %vm31_vm0, %v30_v1, 0.0  ;;  %v111_v31 = vld [vmem:[%s240_s1] ss:$0 sm:$0xff]  ;;  %s99_s30 = sshll.u32 %s176_s29, 4  ;;  %s100_s30 = int_to_ptr.vmem [resolvable:$true] %s99_s30 }
  0x15   :  { %33 = vadd.xlane.f32.xlu0 %v32_v2  ;;  %v112_v33 = vld [vmem:[%s241_s2] ss:$0 sm:$0xff]  ;;  %s147_s4 = scalar_lea.vmem %s100_s30, 256  ;;  %p152_p9 = scmp.lt.s32.totalorder %s100_s30, %s100_s30 }
  0x16   :  { %p148_p8 = scmp.ne.s32.totalorder %s100_s30, %s147_s4  ;;  %p153_p10 = scmp.lt.s32.totalorder %s147_s4, %s147_s4 }
  0x18   :  { %p154_p11 = por %p153_p10, %p152_p9 }
  0x19   :  { %36 = vadd.xlane.f32.xlu0 %v35_v3 }
  0x1a   :  { %p155_p12 = pnand %p154_p11, %p148_p8 }
  0xa2   :  { %v34_v4 = vpop.xlane.xlu0 %33 }
  0xa3   :  { %v39_v5 = vmul.f32 0.03125, %v34_v4 }
  0xa5   :  { %v41_v6 = vsub.f32 %v29_v0, %v39_v5 }
  0xa6   :  { %v37_v7 = vpop.xlane.xlu0 %36 }
  0xa7   :  { %v40_v8 = vmul.f32 0.03125, %v37_v7  ;;  %v43_v9 = vmul.f32 %v41_v6, %v41_v6 }
  0xa9   :  { %v42_v10 = vsub.f32 %v30_v1, %v40_v8  ;;  %v45_v11 = vsel %vm31_vm0, %v43_v9, 0.0 }
  0xaa   :  { %46 = vadd.xlane.f32.xlu1 %v45_v11 }
  0xab   :  { %v44_v12 = vmul.f32 %v42_v10, %v42_v10 }
  0xad   :  { %v48_v13 = vsel %vm31_vm0, %v44_v12, 0.0 }
  0xae   :  { %49 = vadd.xlane.f32.xlu1 %v48_v13 }
 0x137   :  { %v47_v14 = vpop.xlane.xlu1 %46 }
 0x138   :  { %v52_v15 = vmul.f32 0.032258064, %v47_v14 }
 0x13a   :  { %117 = vrsqrt.f32 %v52_v15  ;;  %vm56_vm1 = vcmp.eq.f32.partialorder %v52_v15, inf  ;;  %v59_v20 = vand.u32 2147483648, %v52_v15  ;;  %vm58_vm2 = vcmp.eq.f32.partialorder %v52_v15, 0.0 }
 0x13b   :  { %v50_v16 = vpop.xlane.xlu1 %49 }
 0x13c   :  { %v53_v17 = vmul.f32 0.032258064, %v50_v16 }
 0x13e   :  { %119 = vrsqrt.f32 %v53_v17  ;;  %vm63_vm3 = vcmp.eq.f32.partialorder %v53_v17, inf  ;;  %v66_v26 = vand.u32 2147483648, %v53_v17  ;;  %vm65_vm4 = vcmp.eq.f32.partialorder %v53_v17, 0.0 }
 0x144   :  { %v118_v18 = vpop.eup %117 }
 0x145   :  { %v55_v19 = vmul.f32 %v118_v18, %v52_v15 }
 0x147   :  { %v57_v21 = vsel %vm56_vm1, %v52_v15, %v55_v19 }
 0x148   :  { %v120_v22 = vpop.eup %119  ;;  %v60_v23 = vsel %vm58_vm2, %v59_v20, %v57_v21 }
 0x149   :  { %v68_v24 = vadd.f32 1e-06, %v60_v23  ;;  %v62_v25 = vmul.f32 %v120_v22, %v53_v17 }
 0x14b   :  { %121 = vrcp.f32 %v68_v24  ;;  %v64_v27 = vsel %vm63_vm3, %v53_v17, %v62_v25 }
 0x14c   :  { %v67_v28 = vsel %vm65_vm4, %v66_v26, %v64_v27 }
 0x14d   :  { %v69_v29 = vadd.f32 1e-06, %v67_v28 }
 0x14f   :  { %123 = vrcp.f32 %v69_v29 }
 0x155   :  { %v122_v30 = vpop.eup %121 }
 0x156   :  { %v74_v32 = vmul.f32 %v122_v30, %v41_v6 }
 0x158   :  { %v82_v34 = vmul.f32 %v111_v31, %v74_v32 }
 0x159   :  { %v124_v35 = vpop.eup %123 }
 0x15a   :  { %v75_v36 = vmul.f32 %v124_v35, %v42_v10  ;;  %v90_v37 = vadd.f32 %v112_v33, %v82_v34 }
 0x15c   :  { %v83_v38 = vmul.f32 %v111_v31, %v75_v36  ;;  %92 = vst.msk [vmem:[#allocation5] sm:$0xff] %vm31_vm0, %v90_v37 }
 0x15e   :  { %v91_v39 = vadd.f32 %v112_v33, %v83_v38 }
 0x160   :  { %93 = vst.msk [vmem:[#allocation5 + $0x8] sm:$0xff] %vm31_vm0, %v91_v39 }
 0x161   :  { %158 = shalt.err (!%p155_p12)
}
 0x162   :  { %s159_s5 = scalar_lea.hbm %s242_s3, 256 }
 0x163   :  { %p160_p13 = scmp.ne.s32.totalorder %s242_s3, %s159_s5  ;;  %p163_p0 = scmp.lt.u32.totalorder %s159_s5, %s242_s3 }
 0x165   :  { %p165_p1 = pnand %p163_p0, %p160_p13 }
 0x167   :  { %168 = shalt.err (!%p165_p1)
}
 0x168   :  { %105 = dma.vmem_to_hbm [thread:$0]  %s100_s30, 256, %s242_s3, [#allocation4], %s174_s22, %s174_s22, %s175_s23  }
 0x169   :  { %171 = dma.done.wait [#allocation4], 256  }
 0x16a   :  { %172 = vsyncadd [#allocation4], 4294967040 }
 0x16b   :  { %109 = vsyncpa [#allocation3], 1 }
 0x16c   :  { %110 = vsyncpa [#allocation4], 1 }

</bundles_post_ra>
